<compile_context>
chip_gen: v5e
topology: v5e:2x2
jax: 0.10.0
libtpu: 0.0.40
codegen_flags: <defaults>
</compile_context>

<pallas_src>
import functools

import jax
import jax.numpy as jnp
from jax.experimental import pallas as pl
from jax.experimental.pallas import tpu as pltpu


def _round_up(x, m):
    return ((x + m - 1) // m) * m


def _tpu_generation():
    try:
        kind = jax.devices()[0].device_kind.lower()
    except Exception:
        kind = ""
    if "v7" in kind:
        return "v7x"
    if "v6" in kind:
        return "v6e"
    if "v5" in kind:
        return "v5e"
    return "other"


def _bccm_moment_kernel(id_ref, age_ref, gen_ref, w_id_ref, w_age_ref, w_gen_ref,
                        shift_ref, out_ref, *, b_true, tile_b, tiles_per_split,
                        matvec_precision):
    s = pl.program_id(0)   # split axis (second TensorCore on v7x)
    t = pl.program_id(1)   # reduction over batch tiles

    # Three (TILE_B, E) @ (E, 4) MXU matmuls; each weight matrix has its
    # projection vector in its own output column (others zero), so the packed
    # prediction tile lands directly in its final lanes -- no lane concat.
    p = (jnp.dot(id_ref[...], w_id_ref[...],
                 preferred_element_type=jnp.float32, precision=matvec_precision)
         + jnp.dot(age_ref[...], w_age_ref[...],
                   preferred_element_type=jnp.float32, precision=matvec_precision)
         + jnp.dot(gen_ref[...], w_gen_ref[...],
                   preferred_element_type=jnp.float32, precision=matvec_precision))

    # Row-validity mask from the *unclamped* global row index.  It zeroes both
    # the ragged tail of the last real tile and any duplicated tile produced
    # by the clamped feature index_map (uneven split).  Use select (jnp.where),
    # not multiply, so stale / NaN edge-block rows cannot propagate.  Column 3
    # becomes the validity indicator itself (the count / sum row of the
    # moment matrix).
    base = (s * tiles_per_split + t) * tile_b
    row = base + jax.lax.broadcasted_iota(jnp.int32, (tile_b, 4), 0)
    col = jax.lax.broadcasted_iota(jnp.int32, (tile_b, 4), 1)
    row_ok = row < b_true
    valid_f = row_ok.astype(jnp.float32)
    p = jnp.where(col == 3, valid_f, jnp.where(row_ok, p, 0.0))

    # Shift columns 0..2 by a cheap global mean estimate (column 3 of the
    # shift is 0).  The epilogue is shift-invariant; this only tames the
    # "sum_sq - sum^2/B" cancellation of the one-pass Gram formulation.
    # Padded rows stay exactly zero (valid_f == 0 there).
    q = p - shift_ref[...] * valid_f

    # One Gram matmul per tile replaces nine axis-0 (sublane/XLU) reductions:
    #   G[i,j] = sum(q_i*q_j), G[i,3] = sum(q_i), G[3,3] = valid row count.
    g = jax.lax.dot_general(
        q, q, (((0,), (0,)), ((), ())),
        preferred_element_type=jnp.float32,
        precision=jax.lax.Precision.HIGHEST,
    )

    @pl.when(t == 0)
    def _():
        out_ref[...] = jnp.zeros_like(out_ref)

    out_ref[...] += g.reshape(out_ref.shape)


def bccm_forward(id_features, age_features, gender_features, w_id, w_age, w_gender,
                 *, num_splits=None, tile_b=None, mean_shift=True):
    """id/age/gender features: (B, E) f32 or bf16; w_*: (E, 1). Returns (1,) f32."""
    b, e = id_features.shape
    if b < 2:
        raise ValueError("BCCM requires batch size >= 2 (unbiased variance).")

    gen = _tpu_generation()
    feat_dtype = id_features.dtype
    itemsize = jnp.dtype(feat_dtype).itemsize
    row_align = 16 if itemsize < 4 else 8     # bf16 packs 16 sublanes per vreg

    # Generation-specific launch + VMEM budgets.
    if gen == "v7x":
        default_splits = 2                    # two TensorCores: split pays off
        input_budget = 24 * 1024 * 1024       # only 64 MiB VMEM per TC on v7x
        vmem_limit = 48 * 1024 * 1024
    elif gen in ("v6e", "v5e"):
        default_splits = 1                    # single TC: a split is pure overhead
        input_budget = 48 * 1024 * 1024       # 128 MiB physical VMEM
        vmem_limit = 80 * 1024 * 1024
    else:
        default_splits = 1                    # conservative fallback
        input_budget = 16 * 1024 * 1024
        vmem_limit = 32 * 1024 * 1024
    if num_splits is None:
        num_splits = default_splits
    num_splits = max(1, int(num_splits))

    # Tile sizing from the *lane-padded* footprint: 3 streams x n pipeline
    # buffers x tile_b x round_up(E,128) x itemsize must fit the input budget.
    row_bytes = _round_up(e, 128) * itemsize
    rows_needed = _round_up(pl.cdiv(b, num_splits), row_align)

    def cap_rows(buffers):
        c = input_budget // (3 * buffers * row_bytes)
        return max(row_align, (c // row_align) * row_align)

    n_buffers = 2
    if tile_b is None:
        if gen == "v7x" and cap_rows(2) <= 512 and cap_rows(2) < min(rows_needed, 8192):
            # Very large E forces small tiles on v7x: deepen the pipeline to
            # cover DMA-issue latency across the three feature streams.
            n_buffers = 3
        tile_b = min(8192, rows_needed, cap_rows(n_buffers))
    else:
        tile_b = _round_up(int(tile_b), row_align)
    tile_b = max(row_align, tile_b)

    total_tiles = pl.cdiv(b, tile_b)
    tiles_per_split = pl.cdiv(total_tiles, num_splits)
    last_tile = total_tiles - 1

    # Pack each (E,1) weight into its own column of an (E,4) matrix so the
    # matvec outputs land directly in lanes 0/1/2 (lane 3 stays zero for the
    # validity column).
    def pack_w(w, col_idx):
        w = jnp.asarray(w, jnp.float32).reshape(e)
        out = jnp.zeros((e, 4), jnp.float32).at[:, col_idx].set(w)
        return out.astype(feat_dtype) if itemsize < 4 else out

    w4_id = pack_w(w_id, 0)
    w4_age = pack_w(w_age, 1)
    w4_gen = pack_w(w_gender, 2)

    # Cheap global mean estimate (<= 8 rows), used as a shift inside the
    # kernel.  The moment->correlation epilogue is shift-invariant, so this
    # only improves conditioning of the one-pass moments.
    if mean_shift:
        n_probe = min(b, 8)

        def probe(x, w):
            return jnp.mean(jnp.dot(x[:n_probe].astype(jnp.float32),
                                    jnp.asarray(w, jnp.float32).reshape(e, 1)))

        shift = jnp.stack([probe(id_features, w_id),
                           probe(age_features, w_age),
                           probe(gender_features, w_gender),
                           jnp.zeros((), jnp.float32)]).reshape(1, 4)
    else:
        shift = jnp.zeros((1, 4), jnp.float32)

    # Consistent MXU precision: HIGHEST everywhere for f32 inputs (free while
    # HBM-bound); bf16 inputs are already bf16-limited, use default.
    matvec_precision = None if itemsize < 4 else jax.lax.Precision.HIGHEST

    kernel = functools.partial(
        _bccm_moment_kernel, b_true=b, tile_b=tile_b,
        tiles_per_split=tiles_per_split, matvec_precision=matvec_precision)

    def feat_index(s, t):
        # Clamp so an uneven split never addresses a block past the array;
        # the duplicated tile is fully zeroed by the in-kernel validity mask.
        return (jnp.minimum(s * tiles_per_split + t, last_tile), 0)

    feat_kwargs = {}
    if n_buffers == 3:
        feat_kwargs["pipeline_mode"] = pl.Buffered(3)
    feat_spec = pl.BlockSpec((tile_b, e), feat_index, **feat_kwargs)
    w_spec = pl.BlockSpec((e, 4), lambda s, t: (0, 0))
    shift_spec = pl.BlockSpec((1, 4), lambda s, t: (0, 0))

    partial_g = pl.pallas_call(
        kernel,
        out_shape=jax.ShapeDtypeStruct((num_splits, 4, 4), jnp.float32),
        grid_spec=pltpu.PrefetchScalarGridSpec(
            num_scalar_prefetch=0,
            grid=(num_splits, tiles_per_split),
            in_specs=[feat_spec, feat_spec, feat_spec,
                      w_spec, w_spec, w_spec, shift_spec],
            out_specs=pl.BlockSpec((1, 4, 4), lambda s, t: (s, 0, 0)),
        ),
        compiler_params=pltpu.CompilerParams(
            dimension_semantics=("parallel", "arbitrary"),
            vmem_limit_bytes=vmem_limit,
        ),
    )(id_features, age_features, gender_features, w4_id, w4_age, w4_gen, shift)

    # Tiny (~20-flop) epilogue on the summed (shift-invariant) moment matrix,
    # done in plain JAX so per-split partial moments can be combined here.
    g = jnp.sum(partial_g, axis=0)                       # (4, 4)
    sums = g[3, :3]                                      # (shifted) prediction sums
    sq = jnp.diagonal(g)[:3]                             # (shifted) sums of squares
    var = (sq - sums * sums / b) / (b - 1) + 1e-6        # PyTorch unbiased .var()
    cov_ia = (g[0, 1] - sums[0] * sums[1] / b) / b       # ".mean(dim=0)" covariances
    cov_ig = (g[0, 2] - sums[0] * sums[2] / b) / b
    cov_ag = (g[1, 2] - sums[1] * sums[2] / b) / b
    corr = (cov_ia * cov_ia / (var[1] * var[0])
            + cov_ig * cov_ig / (var[2] * var[0])
            + cov_ag * cov_ag / (var[1] * var[2])) / 3.0
    return corr.reshape((1,))


def _reference(id_f, age_f, gen_f, w_id, w_age, w_gen):
    """Pure-JAX reference mirroring the PyTorch f32 forward (unbiased var)."""
    hp = jax.lax.Precision.HIGHEST
    idp = jnp.dot(id_f.astype(jnp.float32), jnp.asarray(w_id, jnp.float32), precision=hp)
    agep = jnp.dot(age_f.astype(jnp.float32), jnp.asarray(w_age, jnp.float32), precision=hp)
    genp = jnp.dot(gen_f.astype(jnp.float32), jnp.asarray(w_gen, jnp.float32), precision=hp)
    b = idp.shape[0]
    im, am, gm = idp.mean(0), agep.mean(0), genp.mean(0)
    iv = ((idp - im) ** 2).sum(0) / (b - 1) + 1e-6
    av = ((agep - am) ** 2).sum(0) / (b - 1) + 1e-6
    gv = ((genp - gm) ** 2).sum(0) / (b - 1) + 1e-6
    ia = (((agep - am) * (idp - im)).mean(0)) ** 2 / (av * iv)
    ig = (((genp - gm) * (idp - im)).mean(0)) ** 2 / (gv * iv)
    ag = (((agep - am) * (genp - gm)).mean(0)) ** 2 / (av * gv)
    return (ia + ig + ag) / 3.0


if __name__ == "__main__":
    def make_case(key, b, e, dtype=jnp.float32):
        k1, k2, k3, k4, k5, k6 = jax.random.split(key, 6)
        bound = 1.0 / (e ** 0.5)
        return (
            jax.random.normal(k1, (b, e), jnp.float32).astype(dtype),
            jax.random.normal(k2, (b, e), jnp.float32).astype(dtype),
            jax.random.normal(k3, (b, e), jnp.float32).astype(dtype),
            jax.random.uniform(k4, (e, 1), jnp.float32, -bound, bound),
            jax.random.uniform(k5, (e, 1), jnp.float32, -bound, bound),
            jax.random.uniform(k6, (e, 1), jnp.float32, -bound, bound),
        )

    # Case 1: the module's toy shape (B=8, E=32), auto tiling / auto split.
    args = make_case(jax.random.PRNGKey(0), 8, 32)
    out = bccm_forward(*args)
    jax.block_until_ready(out)
    ref = _reference(*args)
    assert out.shape == (1,)
    assert jnp.allclose(out, ref, rtol=1e-4, atol=1e-6), (out, ref)

    # Case 2: ragged batch + forced 2-way split + tiny tiles: exercises the
    # multi-step accumulation, the clamped index_map (duplicated tile) and the
    # edge-tile select mask -- with no wrapper-side padding anywhere.
    args2 = make_case(jax.random.PRNGKey(1), 100, 128)
    out2 = bccm_forward(*args2, num_splits=2, tile_b=16)
    jax.block_until_ready(out2)
    ref2 = _reference(*args2)
    assert out2.shape == (1,)
    assert jnp.allclose(out2, ref2, rtol=1e-4, atol=1e-6), (out2, ref2)

    # Case 3: larger batch with auto (large) tiles and a ragged last tile.
    args3 = make_case(jax.random.PRNGKey(2), 4096, 768)
    out3 = bccm_forward(*args3)
    jax.block_until_ready(out3)
    ref3 = _reference(*args3)
    assert out3.shape == (1,)
    assert jnp.allclose(out3, ref3, rtol=1e-3, atol=1e-6), (out3, ref3)

    print("KERNEL_OK")
</pallas_src>

<mosaic_0001>
module attributes {stable_mosaic.version = 11 : i64} {
  func.func @_bccm_moment_kernel(%arg0: i32, %arg1: i32, %arg2: memref<8x32xf32, #tpu.memory_space<vmem>>, %arg3: memref<8x32xf32, #tpu.memory_space<vmem>>, %arg4: memref<8x32xf32, #tpu.memory_space<vmem>>, %arg5: memref<32x4xf32, #tpu.memory_space<vmem>>, %arg6: memref<32x4xf32, #tpu.memory_space<vmem>>, %arg7: memref<32x4xf32, #tpu.memory_space<vmem>>, %arg8: memref<1x4xf32, #tpu.memory_space<vmem>>, %arg9: memref<1x4x4xf32, #tpu.memory_space<vmem>>) attributes {dimension_semantics = [#tpu.dimension_semantics<parallel>, #tpu.dimension_semantics<arbitrary>], iteration_bounds = array<i64: 1, 1>, scalar_prefetch = 0 : i64, scratch_operands = 0 : i64, tpu.core_type = #tpu.core_type<tc>, window_params = [{transform_indices = @transform_0, window_bounds = array<i64: 8, 32>}, {transform_indices = @transform_1, window_bounds = array<i64: 8, 32>}, {transform_indices = @transform_2, window_bounds = array<i64: 8, 32>}, {pipeline_mode = #tpu.pipeline_mode<synchronous>, transform_indices = @transform_3, window_bounds = array<i64: 32, 4>}, {pipeline_mode = #tpu.pipeline_mode<synchronous>, transform_indices = @transform_4, window_bounds = array<i64: 32, 4>}, {pipeline_mode = #tpu.pipeline_mode<synchronous>, transform_indices = @transform_5, window_bounds = array<i64: 32, 4>}, {pipeline_mode = #tpu.pipeline_mode<synchronous>, transform_indices = @transform_6, window_bounds = array<i64: 1, 4>}, {transform_indices = @transform_7, window_bounds = array<i64: 1, 4, 4>}]} {
    %c0 = arith.constant 0 : index
    %c0_0 = arith.constant 0 : index
    %0 = vector.load %arg2[%c0, %c0_0] : memref<8x32xf32, #tpu.memory_space<vmem>>, vector<8x32xf32>
    %c0_1 = arith.constant 0 : index
    %c0_2 = arith.constant 0 : index
    %1 = vector.load %arg5[%c0_1, %c0_2] : memref<32x4xf32, #tpu.memory_space<vmem>>, vector<32x4xf32>
    %cst = arith.constant dense<0.000000e+00> : vector<8x4xf32>
    %2 = tpu.matmul %0, %1, %cst {dimension_numbers = #tpu.dot_dimension_numbers<[1], [0], [0], [1], [0, 0, 1, 1], [], []>, precision = #tpu.contract_precision<fp32>} : vector<8x32xf32>, vector<32x4xf32>, vector<8x4xf32> -> vector<8x4xf32>
    %c0_3 = arith.constant 0 : index
    %c0_4 = arith.constant 0 : index
    %3 = vector.load %arg3[%c0_3, %c0_4] : memref<8x32xf32, #tpu.memory_space<vmem>>, vector<8x32xf32>
    %c0_5 = arith.constant 0 : index
    %c0_6 = arith.constant 0 : index
    %4 = vector.load %arg6[%c0_5, %c0_6] : memref<32x4xf32, #tpu.memory_space<vmem>>, vector<32x4xf32>
    %cst_7 = arith.constant dense<0.000000e+00> : vector<8x4xf32>
    %5 = tpu.matmul %3, %4, %cst_7 {dimension_numbers = #tpu.dot_dimension_numbers<[1], [0], [0], [1], [0, 0, 1, 1], [], []>, precision = #tpu.contract_precision<fp32>} : vector<8x32xf32>, vector<32x4xf32>, vector<8x4xf32> -> vector<8x4xf32>
    %6 = arith.addf %2, %5 : vector<8x4xf32>
    %c0_8 = arith.constant 0 : index
    %c0_9 = arith.constant 0 : index
    %7 = vector.load %arg4[%c0_8, %c0_9] : memref<8x32xf32, #tpu.memory_space<vmem>>, vector<8x32xf32>
    %c0_10 = arith.constant 0 : index
    %c0_11 = arith.constant 0 : index
    %8 = vector.load %arg7[%c0_10, %c0_11] : memref<32x4xf32, #tpu.memory_space<vmem>>, vector<32x4xf32>
    %cst_12 = arith.constant dense<0.000000e+00> : vector<8x4xf32>
    %9 = tpu.matmul %7, %8, %cst_12 {dimension_numbers = #tpu.dot_dimension_numbers<[1], [0], [0], [1], [0, 0, 1, 1], [], []>, precision = #tpu.contract_precision<fp32>} : vector<8x32xf32>, vector<32x4xf32>, vector<8x4xf32> -> vector<8x4xf32>
    %10 = arith.addf %6, %9 : vector<8x4xf32>
    %c1_i32 = arith.constant 1 : i32
    %11 = arith.muli %arg0, %c1_i32 : i32
    %12 = arith.addi %11, %arg1 : i32
    %c8_i32 = arith.constant 8 : i32
    %13 = arith.muli %12, %c8_i32 : i32
    %14 = tpu.iota {dimensions = array<i32: 0>} : vector<8x4xi32>
    %15 = vector.broadcast %13 : i32 to vector<8x4xi32>
    %16 = arith.addi %15, %14 : vector<8x4xi32>
    %17 = tpu.iota {dimensions = array<i32: 1>} : vector<8x4xi32>
    %c8_i32_13 = arith.constant 8 : i32
    %18 = vector.broadcast %c8_i32_13 : i32 to vector<8x4xi32>
    %19 = arith.cmpi slt, %16, %18 : vector<8x4xi32>
    %20 = arith.extui %19 : vector<8x4xi1> to vector<8x4xi32>
    %21 = arith.sitofp %20 : vector<8x4xi32> to vector<8x4xf32>
    %c3_i32 = arith.constant 3 : i32
    %22 = vector.broadcast %c3_i32 : i32 to vector<8x4xi32>
    %23 = arith.cmpi eq, %17, %22 : vector<8x4xi32>
    %cst_14 = arith.constant 0.000000e+00 : f32
    %24 = vector.broadcast %cst_14 : f32 to vector<8x4xf32>
    %25 = arith.select %19, %10, %24 : vector<8x4xi1>, vector<8x4xf32>
    %26 = arith.select %23, %21, %25 : vector<8x4xi1>, vector<8x4xf32>
    %c0_15 = arith.constant 0 : index
    %c0_16 = arith.constant 0 : index
    %27 = vector.load %arg8[%c0_15, %c0_16] : memref<1x4xf32, #tpu.memory_space<vmem>>, vector<1x4xf32>
    %28 = vector.broadcast %27 : vector<1x4xf32> to vector<8x4xf32>
    %29 = arith.mulf %28, %21 : vector<8x4xf32>
    %30 = arith.subf %26, %29 : vector<8x4xf32>
    %cst_17 = arith.constant dense<0.000000e+00> : vector<4x4xf32>
    %31 = tpu.matmul %30, %30, %cst_17 {dimension_numbers = #tpu.dot_dimension_numbers<[0], [0], [1], [1], [0, 1, 1, 1], [], []>, precision = #tpu.contract_precision<fp32>} : vector<8x4xf32>, vector<8x4xf32>, vector<4x4xf32> -> vector<4x4xf32>
    %c0_i32 = arith.constant 0 : i32
    %32 = arith.cmpi eq, %arg1, %c0_i32 : i32
    %33 = arith.extui %32 : i1 to i32
    %c0_i32_18 = arith.constant 0 : i32
    %34 = arith.cmpi ne, %33, %c0_i32_18 : i32
    scf.if %34 {
      %cst_25 = arith.constant 0.000000e+00 : f32
      %39 = vector.broadcast %cst_25 : f32 to vector<1x4x4xf32>
      %c0_26 = arith.constant 0 : index
      %c0_27 = arith.constant 0 : index
      %c0_28 = arith.constant 0 : index
      %40 = vector.load %arg9[%c0_26, %c0_27, %c0_28] : memref<1x4x4xf32, #tpu.memory_space<vmem>>, vector<1x4x4xf32>
      tpu.vector_store %arg9[%c0_26, %c0_27, %c0_28], %39 {strides = array<i32>} : memref<1x4x4xf32, #tpu.memory_space<vmem>>, vector<1x4x4xf32>,
    } else {
    }
    %c0_19 = arith.constant 0 : index
    %c0_20 = arith.constant 0 : index
    %c0_21 = arith.constant 0 : index
    %35 = vector.load %arg9[%c0_19, %c0_20, %c0_21] : memref<1x4x4xf32, #tpu.memory_space<vmem>>, vector<1x4x4xf32>
    %36 = vector.shape_cast %31 : vector<4x4xf32> to vector<1x4x4xf32>
    %37 = arith.addf %35, %36 : vector<1x4x4xf32>
    %c0_22 = arith.constant 0 : index
    %c0_23 = arith.constant 0 : index
    %c0_24 = arith.constant 0 : index
    %38 = vector.load %arg9[%c0_22, %c0_23, %c0_24] : memref<1x4x4xf32, #tpu.memory_space<vmem>>, vector<1x4x4xf32>
    tpu.vector_store %arg9[%c0_22, %c0_23, %c0_24], %37 {strides = array<i32>} : memref<1x4x4xf32, #tpu.memory_space<vmem>>, vector<1x4x4xf32>,
    return
  }
  func.func @transform_0(%arg0: i32, %arg1: i32) -> (i32, i32) {
    %c1_i32 = arith.constant 1 : i32
    %0 = arith.muli %arg0, %c1_i32 : i32
    %1 = arith.addi %0, %arg1 : i32
    %c0_i32 = arith.constant 0 : i32
    %2 = arith.minsi %1, %c0_i32 : i32
    %c0_i32_0 = arith.constant 0 : i32
    %c0_i32_1 = arith.constant 0 : i32
    return %2, %c0_i32_0 : i32, i32
  }
  func.func @transform_1(%arg0: i32, %arg1: i32) -> (i32, i32) {
    %c1_i32 = arith.constant 1 : i32
    %0 = arith.muli %arg0, %c1_i32 : i32
    %1 = arith.addi %0, %arg1 : i32
    %c0_i32 = arith.constant 0 : i32
    %2 = arith.minsi %1, %c0_i32 : i32
    %c0_i32_0 = arith.constant 0 : i32
    %c0_i32_1 = arith.constant 0 : i32
    return %2, %c0_i32_0 : i32, i32
  }
  func.func @transform_2(%arg0: i32, %arg1: i32) -> (i32, i32) {
    %c1_i32 = arith.constant 1 : i32
    %0 = arith.muli %arg0, %c1_i32 : i32
    %1 = arith.addi %0, %arg1 : i32
    %c0_i32 = arith.constant 0 : i32
    %2 = arith.minsi %1, %c0_i32 : i32
    %c0_i32_0 = arith.constant 0 : i32
    %c0_i32_1 = arith.constant 0 : i32
    return %2, %c0_i32_0 : i32, i32
  }
  func.func @transform_3(%arg0: i32, %arg1: i32) -> (i32, i32) {
    %c0_i32 = arith.constant 0 : i32
    %c0_i32_0 = arith.constant 0 : i32
    %c0_i32_1 = arith.constant 0 : i32
    return %c0_i32, %c0_i32_0 : i32, i32
  }
  func.func @transform_4(%arg0: i32, %arg1: i32) -> (i32, i32) {
    %c0_i32 = arith.constant 0 : i32
    %c0_i32_0 = arith.constant 0 : i32
    %c0_i32_1 = arith.constant 0 : i32
    return %c0_i32, %c0_i32_0 : i32, i32
  }
  func.func @transform_5(%arg0: i32, %arg1: i32) -> (i32, i32) {
    %c0_i32 = arith.constant 0 : i32
    %c0_i32_0 = arith.constant 0 : i32
    %c0_i32_1 = arith.constant 0 : i32
    return %c0_i32, %c0_i32_0 : i32, i32
  }
  func.func @transform_6(%arg0: i32, %arg1: i32) -> (i32, i32) {
    %c0_i32 = arith.constant 0 : i32
    %c0_i32_0 = arith.constant 0 : i32
    %c0_i32_1 = arith.constant 0 : i32
    return %c0_i32, %c0_i32_0 : i32, i32
  }
  func.func @transform_7(%arg0: i32, %arg1: i32) -> (i32, i32, i32) {
    %c0_i32 = arith.constant 0 : i32
    %c0_i32_0 = arith.constant 0 : i32
    %c0_i32_1 = arith.constant 0 : i32
    return %arg0, %c0_i32, %c0_i32_0 : i32, i32, i32
  }
}

</mosaic_0001>

<bundles_post_ra>
// kernel: tpu_custom_call.1
= control target key start
LH: loop header
LB: loop body
LE: loop exit
PB: predicated region body
PF: predicated region fallthrough
CT: control target
= control target key end

     0   :  { %vm118_vm0 = vcmask 261120   ;;  %s1214_s0 = inlined_call_operand.vmem [shape: f32[8,32], index: 0, kind: input, shape index: {}]   ;;  %s1215_s1 = inlined_call_operand.vmem [shape: f32[8,32], index: 1, kind: input, shape index: {}]   ;;  %s1216_s2 = inlined_call_operand.vmem [shape: f32[8,32], index: 2, kind: input, shape index: {}]   ;;  %s1217_s3 = inlined_call_operand.vmem [shape: f32[32,4], index: 3, kind: input, shape index: {}]   ;;  %s1218_s4 = inlined_call_operand.vmem [shape: f32[32,4], index: 4, kind: input, shape index: {}]   ;;  %s1219_s5 = inlined_call_operand.vmem [shape: f32[32,4], index: 5, kind: input, shape index: {}]   ;;  %s1220_s6 = inlined_call_operand.vmem [shape: f32[1,4], index: 6, kind: input, shape index: {}]   ;;  %s1221_s7 = inlined_call_operand.hbm [shape: f32[1,4,4], index: 7, kind: output, shape index: {}]  }
   0x1   :  { %v117_v0 = vld [vmem:[%s1218_s4 + $0x18] sm:$0xff]  ;;  %v116_v1 = vld [vmem:[%s1218_s4 + $0x10] sm:$0xff]  ;;  %v115_v2 = vld [vmem:[%s1218_s4 + $0x8] sm:$0xff] }
   0x2   :  { %v1015_v3 = vand.u32 4294901760, %v117_v0  ;;  %v1017_v4 = vand.u32 4294901760, %v116_v1  ;;  %v1019_v5 = vand.u32 4294901760, %v115_v2  ;;  %v114_v6 = vld [vmem:[%s1218_s4] sm:$0xff]  ;;  %v112_v12 = vld [vmem:[%s1217_s3 + $0x18] sm:$0xff]  ;;  %v111_v13 = vld [vmem:[%s1217_s3 + $0x10] sm:$0xff] }
   0x3   :  { %v108_v7 = vld [vmem:[%s1214_s0] sm:$0xff]  ;;  %v1030_v9 = vand.u32 4294901760, %v114_v6  ;;  %v110_v18 = vld [vmem:[%s1217_s3 + $0x8] sm:$0xff]  ;;  %v1059_v21 = vand.u32 4294901760, %v112_v12  ;;  %v1061_v22 = vand.u32 4294901760, %v111_v13 }
   0x4   :  { %v113_v8 = vld [vmem:[%s1215_s1] sm:$0xff]  ;;  %v308_v11 = vsel %vm118_vm0, %v108_v7, 0  ;;  %v164_v14 = vsub.f32 %v117_v0, %v1015_v3  ;;  %135 = vmatpush.msra.mxu0 %v1015_v3  ;;  %v1043_v15 = vsub.f32 %v116_v1, %v1017_v4  ;;  %235 = vmatpush.msra.mxu3 %v1015_v3  ;;  %v1047_v16 = vsub.f32 %v115_v2, %v1019_v5 }
   0x5   :  { %v120_v10 = vsel %vm118_vm0, %v113_v8, 0  ;;  %v1055_v19 = vsub.f32 %v114_v6, %v1030_v9  ;;  %v1057_v20 = vand.u32 4294901760, %v308_v11  ;;  %v109_v27 = vld [vmem:[%s1217_s3] sm:$0xff]  ;;  %v1072_v28 = vsub.f32 %v112_v12, %v1059_v21 }
   0x6   :  { %v1049_v17 = vand.u32 4294901760, %v120_v10  ;;  %206 = vmatpush.msra.mxu2 %v164_v14  ;;  %137 = vmatpush.msra.mxu0 %v1017_v4  ;;  %v165_v23 = vand.u32 4294901760, %v164_v14  ;;  %v171_v24 = vand.u32 4294901760, %v1043_v15  ;;  %v177_v26 = vand.u32 4294901760, %v1047_v16 }
   0x7   :  { %237 = vmatpush.msra.mxu3 %v1017_v4  ;;  %v183_v29 = vand.u32 4294901760, %v1055_v19  ;;  %v1075_v30 = vand.u32 4294901760, %v110_v18  ;;  %v1078_v31 = vsub.f32 %v111_v13, %v1061_v22 }
   0x8   :  { %v143_v25 = vsub.f32 %v120_v10, %v1049_v17 }
   0x9   :  { %12 = vsyncpa [#allocation3], 0  ;;  %209 = vmatpush.msra.mxu2 %v1043_v15  ;;  %v166_v32 = vsub.f32 %v164_v14, %v165_v23  ;;  %139 = vmatpush.msra.mxu0 %v1019_v5  ;;  %v172_v33 = vsub.f32 %v1043_v15, %v171_v24  ;;  %v178_v34 = vsub.f32 %v1047_v16, %v177_v26  ;;  %v353_v36 = vand.u32 4294901760, %v1072_v28  ;;  %v499_v57 = vld [vmem:[%s1219_s5 + $0x18] sm:$0xff]  ;;  %v498_v61 = vld [vmem:[%s1219_s5 + $0x10] sm:$0xff]  ;;  %s908_s30 = sshll.u32 %s1221_s7, 4  ;;  %s909_s30 = int_to_ptr.hbm [resolvable:$true] %s908_s30 }
   0xa   :  { %v144_v35 = vand.u32 4294901760, %v143_v25  ;;  %239 = vmatpush.msra.mxu3 %v1019_v5  ;;  %v359_v37 = vand.u32 4294901760, %v1078_v31  ;;  %v1087_v38 = vand.u32 4294901760, %v109_v27  ;;  %v184_v42 = vsub.f32 %v1055_v19, %v183_v29  ;;  %v495_v0 = vld [vmem:[%s1216_s2] sm:$0xff]  ;;  %v497_v2 = vld [vmem:[%s1219_s5 + $0x8] sm:$0xff] }
   0xb   :  { %v167_v39 = vand.u32 4294901760, %v166_v32  ;;  %212 = vmatpush.msra.mxu2 %v1047_v16  ;;  %v173_v40 = vand.u32 4294901760, %v172_v33  ;;  %141 = vmatpush.msra.mxu0 %v1030_v9  ;;  %v354_v43 = vsub.f32 %v1072_v28, %v353_v36  ;;  %v1100_v45 = vsub.f32 %v110_v18, %v1075_v30  ;;  %v496_v7 = vld [vmem:[%s1219_s5] sm:$0xff] }
   0xc   :  { %v145_v41 = vsub.f32 %v143_v25, %v144_v35  ;;  %241 = vmatpush.msra.mxu3 %v1030_v9  ;;  %v360_v44 = vsub.f32 %v1078_v31, %v359_v37  ;;  %v179_v46 = vand.u32 4294901760, %v178_v34  ;;  %v1104_v48 = vsub.f32 %v308_v11, %v1057_v20 }
   0xd   :  { %264 = vmatpush.msrb.mxu0 %v165_v23  ;;  %168 = vmatpush.msra.mxu1 %v167_v39  ;;  %v1107_v49 = vsub.f32 %v109_v27, %v1087_v38  ;;  %v355_v50 = vand.u32 4294901760, %v354_v43  ;;  %v365_v52 = vand.u32 4294901760, %v1100_v45  ;;  %v185_v53 = vand.u32 4294901760, %v184_v42 }
   0xe   :  { %215 = vmatpush.msra.mxu2 %v1055_v19  ;;  %v146_v47 = vand.u32 4294901760, %v145_v41  ;;  %245 = vmatmul.f32.vlgmr.msra.gmra.mxu3 %v144_v35  ;;  %v361_v51 = vand.u32 4294901760, %v360_v44  ;;  %v332_v54 = vand.u32 4294901760, %v1104_v48  ;;  %v1126_v63 = vand.u32 4294901760, %v499_v57 }
   0xf   :  { %218 = vmatmul.f32.vlgmr.msra.gmra.mxu2 %v143_v25  ;;  %174 = vmatpush.msra.mxu1 %v173_v40  ;;  %v371_v55 = vand.u32 4294901760, %v1107_v49  ;;  %v366_v56 = vsub.f32 %v1100_v45, %v365_v52  ;;  %v1137_v6 = vand.u32 4294901760, %v498_v61  ;;  %v501_v8 = vsel %vm118_vm0, %v495_v0, 0 }
  0x10   :  { %323 = vmatpush.msrb.mxu2 %v1059_v21  ;;  %147 = vmatmul.f32.vlgmr.msra.gmra.mxu0 %v146_v47  ;;  %v333_v58 = vsub.f32 %v1104_v48, %v332_v54  ;;  %v1147_v10 = vsub.f32 %v499_v57, %v1126_v63  ;;  %v1156_v12 = vand.u32 4294901760, %v496_v7  ;;  %v1158_v13 = vand.u32 4294901760, %v501_v8 }
  0x11   :  { %356 = vmatpush.msrb.mxu3 %v355_v50  ;;  %180 = vmatpush.msra.mxu1 %v179_v46  ;;  %v372_v59 = vsub.f32 %v1107_v49, %v371_v55  ;;  %v367_v60 = vand.u32 4294901760, %v366_v56  ;;  %v1154_v11 = vsub.f32 %v498_v61, %v1137_v6  ;;  %vm741_vm2 = vcmask 64512  }
  0x12   :  { %325 = vmatpush.msrb.mxu2 %v1061_v22  ;;  %268 = vmatpush.msrb.mxu0 %v171_v24  ;;  %v334_v62 = vand.u32 4294901760, %v333_v58  ;;  %v563_v15 = vsub.f32 %v496_v7, %v1156_v12  ;;  %vm895_vm3 = vcmask 27648  }
  0x13   :  { %362 = vmatpush.msrb.mxu3 %v361_v51  ;;  %186 = vmatpush.msra.mxu1 %v185_v53  ;;  %v373_v1 = vand.u32 4294901760, %v372_v59  ;;  %v552_v14 = vand.u32 4294901760, %v1154_v11 }
  0x14   :  { %327 = vmatpush.msrb.mxu2 %v1075_v30  ;;  %188 = vmatmul.f32.vlgmr.msra.gmra.mxu1 %v1049_v17 }
  0x15   :  { %272 = vmatpush.msrb.mxu0 %v177_v26  ;;  %295 = vmatpush.msrb.mxu1 %v1015_v3  ;;  %v1149_v3 = vand.u32 4294901760, %v497_v2  ;;  %v553_v18 = vsub.f32 %v1154_v11, %v552_v14 }
  0x16   :  { %329 = vmatpush.msrb.mxu2 %v1087_v38  ;;  %368 = vmatpush.msrb.mxu3 %v367_v60 }
  0x17   :  { %276 = vmatpush.msrb.mxu0 %v183_v29  ;;  %297 = vmatpush.msrb.mxu1 %v1017_v4  ;;  %v546_v4 = vand.u32 4294901760, %v1147_v10  ;;  %v554_v24 = vand.u32 4294901760, %v553_v18 }
  0x18   :  { %335 = vmatmul.f32.vlgmr.msrb.gmra.mxu2 %v334_v62  ;;  %374 = vmatpush.msrb.mxu3 %v373_v1  ;;  %v937_v1 = vld [vmem:[%s1220_s6] ss:$0 sm:$0xff]  ;;  %s965_s6 = smov [#allocation2]  }
  0x19   :  { %452 = vmatpush.msra.mxu2 %v353_v36  ;;  %299 = vmatpush.msrb.mxu1 %v1019_v5  ;;  %v557_v5 = vsub.f32 %v497_v2, %v1149_v3  ;;  %v547_v16 = vsub.f32 %v1147_v10, %v546_v4  ;;  %s906_s27 = sshll.u32 %s965_s6, 4  ;;  %s907_s27 = int_to_ptr.vmem [resolvable:$true] %s906_s27 }
  0x1a   :  { %278 = vmatmul.f32.vlgmr.msrb.gmra.mxu0 %v1049_v17  ;;  %376 = vmatmul.f32.vlgmr.msrb.gmra.mxu3 %v1057_v20 }
  0x1b   :  { %394 = vmatpush.msra.mxu0 %v1072_v28  ;;  %301 = vmatpush.msrb.mxu1 %v1030_v9  ;;  %v524_v9 = vsub.f32 %v501_v8, %v1158_v13 }
  0x1c   :  { %456 = vmatpush.msra.mxu2 %v359_v37  ;;  %483 = vmatpush.msra.mxu3 %v1059_v21 }
  0x1d   :  { %303 = vmatmul.f32.vlgmr.msrb.gmra.mxu1 %v1049_v17  ;;  %397 = vmatpush.msra.mxu0 %v1078_v31  ;;  %v558_v17 = vand.u32 4294901760, %v557_v5  ;;  %v525_v19 = vand.u32 4294901760, %v524_v9 }
  0x1e   :  { %423 = vmatpush.msra.mxu1 %v1059_v21  ;;  %460 = vmatpush.msra.mxu2 %v365_v52  ;;  %v564_v21 = vand.u32 4294901760, %v563_v15 }
  0x1f   :  { %485 = vmatpush.msra.mxu3 %v1061_v22  ;;  %400 = vmatpush.msra.mxu0 %v1100_v45  ;;  %v559_v23 = vsub.f32 %v557_v5, %v558_v17  ;;  %v526_v25 = vsub.f32 %v524_v9, %v525_v19 }
  0x20   :  { %425 = vmatpush.msra.mxu1 %v1061_v22  ;;  %464 = vmatpush.msra.mxu2 %v371_v55  ;;  %v548_v22 = vand.u32 4294901760, %v547_v16  ;;  %v565_v26 = vsub.f32 %v563_v15, %v564_v21 }
  0x21   :  { %487 = vmatpush.msra.mxu3 %v1075_v30  ;;  %403 = vmatpush.msra.mxu0 %v1107_v49  ;;  %v560_v27 = vand.u32 4294901760, %v559_v23 }
  0x22   :  { %427 = vmatpush.msra.mxu1 %v1075_v30  ;;  %466 = vmatmul.f32.vlgmr.msra.gmra.mxu2 %v1057_v20  ;;  %v566_v28 = vand.u32 4294901760, %v565_v26 }
  0x23   :  { %489 = vmatpush.msra.mxu3 %v1087_v38  ;;  %587 = vmatpush.msrb.mxu2 %v1147_v10 }
  0x24   :  { %406 = vmatmul.f32.vlgmr.msra.gmra.mxu0 %v1104_v48  ;;  %429 = vmatpush.msra.mxu1 %v1087_v38 }
  0x25   :  { %491 = vmatmul.f32.vlgmr.msra.gmra.mxu3 %v1057_v20  ;;  %516 = vmatpush.msrb.mxu0 %v1126_v63  ;;  %v527_v20 = vand.u32 4294901760, %v526_v25 }
  0x26   :  { %590 = vmatpush.msrb.mxu2 %v1154_v11  ;;  %616 = vmatpush.msrb.mxu3 %v1126_v63 }
  0x27   :  { %433 = vmatmul.f32.vlgmr.msra.gmra.mxu1 %v332_v54  ;;  %518 = vmatpush.msrb.mxu0 %v1137_v6  ;;  %v695_v54 = vlaneseq }
  0x28   :  { %549 = vmatpush.msrb.mxu1 %v548_v22  ;;  %593 = vmatpush.msrb.mxu2 %v557_v5 }
  0x29   :  { %618 = vmatpush.msrb.mxu3 %v1137_v6  ;;  %520 = vmatpush.msrb.mxu0 %v1149_v3  ;;  %v696_v60 = vand.u32 127, %v695_v54 }
  0x2a   :  { %555 = vmatpush.msrb.mxu1 %v554_v24  ;;  %596 = vmatpush.msrb.mxu2 %v563_v15 }
  0x2b   :  { %620 = vmatpush.msrb.mxu3 %v1149_v3  ;;  %522 = vmatpush.msrb.mxu0 %v1156_v12  ;;  %vm700_vm1 = vcmp.eq.s32.totalorder %v696_v60, 3 }
  0x2c   :  { %561 = vmatpush.msrb.mxu1 %v560_v27  ;;  %599 = vmatmul.f32.vlgmr.msrb.gmra.mxu2 %v524_v9 }
  0x2d   :  { %622 = vmatpush.msrb.mxu3 %v1156_v12  ;;  %528 = vmatmul.f32.vlgmr.msrb.gmra.mxu0 %v527_v20 }
  0x2e   :  { %567 = vmatpush.msrb.mxu1 %v566_v28  ;;  %626 = vmatmul.f32.vlgmr.msrb.gmra.mxu3 %v525_v19 }
  0x2f   :  { %645 = vmatpush.msra.mxu0 %v546_v4  ;;  %569 = vmatmul.f32.vlgmr.msrb.gmra.mxu1 %v1158_v13 }
  0x30   :  { %676 = vmatpush.msra.mxu1 %v1126_v63 }
  0x31   :  { %649 = vmatpush.msra.mxu0 %v552_v14 }
  0x32   :  { %678 = vmatpush.msra.mxu1 %v1137_v6 }
  0x33   :  { %653 = vmatpush.msra.mxu0 %v558_v17  ;;  %v964_v17 = vmov 0.0  }
  0x34   :  { %680 = vmatpush.msra.mxu1 %v1149_v3  ;;  %896 = vst.msk [vmem:[#allocation2] sm:$0xf] %vm895_vm3, %v964_v17 }
  0x35   :  { %657 = vmatpush.msra.mxu0 %v564_v21 }
  0x36   :  { %659 = vmatmul.f32.vlgmr.msra.gmra.mxu0 %v1158_v13  ;;  %682 = vmatpush.msra.mxu1 %v1156_v12 }
  0x37   :  { %684 = vmatmul.f32.vlgmr.msra.gmra.mxu1 %v1158_v13 }
  0x3b   :  { %v897_v28 = vld [vmem:[#allocation2] sm:$0xf] }
  0x8d   :  { %v148_v29 = vpop.f32.mrf.mxu0 }
  0x91   :  { %v189_v30 = vpop.f32.mrf.mxu1  ;;  %v246_v33 = vpop.f32.mrf.mxu3 }
  0x92   :  { %v219_v31 = vpop.f32.mrf.mxu2  ;;  %v190_v32 = vadd.f32 %v189_v30, %v148_v29 }
  0x94   :  { %v220_v34 = vadd.f32 %v219_v31, %v190_v32 }
  0x96   :  { %v247_v35 = vadd.f32 %v246_v33, %v220_v34 }
  0x97   :  { %v279_v36 = vpop.f32.mrf.mxu0 }
  0x98   :  { %v280_v38 = vadd.f32 %v279_v36, %v247_v35 }
  0x9a   :  { %v304_v37 = vpop.f32.mrf.mxu1 }
  0x9b   :  { %v336_v39 = vpop.f32.mrf.mxu2  ;;  %v305_v41 = vadd.f32 %v304_v37, %v280_v38 }
  0x9d   :  { %v377_v40 = vpop.f32.mrf.mxu3  ;;  %v337_v43 = vadd.f32 %v336_v39, %v305_v41 }
  0x9f   :  { %v378_v46 = vadd.f32 %v377_v40, %v337_v43 }
  0xa1   :  { %v407_v42 = vpop.f32.mrf.mxu0 }
  0xa2   :  { %v408_v48 = vadd.f32 %v407_v42, %v378_v46 }
  0xa4   :  { %v434_v44 = vpop.f32.mrf.mxu1 }
  0xa5   :  { %v467_v45 = vpop.f32.mrf.mxu2  ;;  %v435_v52 = vadd.f32 %v434_v44, %v408_v48 }
  0xa7   :  { %v468_v57 = vadd.f32 %v467_v45, %v435_v52 }
  0xa8   :  { %v492_v47 = vpop.f32.mrf.mxu3 }
  0xa9   :  { %v493_v63 = vadd.f32 %v492_v47, %v468_v57 }
  0xaa   :  { %v529_v49 = vpop.f32.mrf.mxu0 }
  0xac   :  { %v570_v50 = vpop.f32.mrf.mxu1 }
  0xad   :  { %v571_v51 = vadd.f32 %v570_v50, %v529_v49 }
  0xaf   :  { %v600_v53 = vpop.f32.mrf.mxu2 }
  0xb0   :  { %v601_v55 = vadd.f32 %v600_v53, %v571_v51 }
  0xb1   :  { %v627_v56 = vpop.f32.mrf.mxu3 }
  0xb2   :  { %v628_v58 = vadd.f32 %v627_v56, %v601_v55 }
  0xb3   :  { %v660_v59 = vpop.f32.mrf.mxu0 }
  0xb4   :  { %v661_v61 = vadd.f32 %v660_v59, %v628_v58  ;;  %v685_v62 = vpop.f32.mrf.mxu1 }
  0xb6   :  { %v686_v0 = vadd.f32 %v685_v62, %v661_v61 }
  0xb8   :  { %v688_v2 = vadd.f32 %v686_v0, %v493_v63 }
  0xba   :  { %v702_v6 = vsel %vm700_vm1, 1.0, %v688_v2 }
  0xbb   :  { %v708_v7 = vsub.f32 %v702_v6, %v937_v1 }
  0xbd   :  { %709 = vxpose.xlu0.b32.start.end [1/1] (short) (narrow) %v708_v7, 8  ;;  %v760_v8 = vand.u32 4294901760, %v708_v7 }
  0xbf   :  { %761 = vmatpush.msra.mxu2 %v760_v8  ;;  %837 = vmatpush.msrb.mxu1 %v760_v8  ;;  %v787_v10 = vsub.f32 %v708_v7, %v760_v8 }
  0xc1   :  { %814 = vmatpush.msrb.mxu0 %v787_v10  ;;  %v788_v3 = vand.u32 4294901760, %v787_v10 }
  0xc3   :  { %863 = vmatpush.msrb.mxu2 %v788_v3  ;;  %v789_v11 = vsub.f32 %v787_v10, %v788_v3 }
  0xc5   :  { %v790_v12 = vand.u32 4294901760, %v789_v11 }
  0xc7   :  { %791 = vmatpush.msra.mxu3 %v790_v12 }
  0xc9   :  { %885 = vmatpush.msrb.mxu3 %v760_v8 }
 0x161   :  { %v725_v13 = vpop.trf.xlu0 }
 0x162   :  { %v743_v4 = vsel %vm741_vm2, %v725_v13, 0 }
 0x163   :  { %v762_v5 = vand.u32 4294901760, %v743_v4 }
 0x165   :  { %v763_v14 = vsub.f32 %v743_v4, %v762_v5  ;;  %793 = vmatmul.f32.vlgmr.msra.gmra.mxu3 %v762_v5 }
 0x167   :  { %v764_v15 = vand.u32 4294901760, %v763_v14  ;;  %817 = vmatmul.f32.vlgmr.msrb.gmra.mxu0 %v763_v14 }
 0x169   :  { %v765_v9 = vsub.f32 %v763_v14, %v764_v15  ;;  %841 = vmatmul.f32.vlgmr.msrb.gmra.mxu1 %v764_v15 }
 0x16b   :  { %v766_v16 = vand.u32 4294901760, %v765_v9 }
 0x16d   :  { %767 = vmatmul.f32.vlgmr.msra.gmra.mxu2 %v766_v16  ;;  %887 = vmatmul.f32.vlgmr.msrb.gmra.mxu3 %v762_v5 }
 0x175   :  { %865 = vmatmul.f32.vlgmr.msrb.gmra.mxu2 %v762_v5 }
 0x1e4   :  { %v818_v22 = vpop.f32.mrf.mxu0 }
 0x1e6   :  { %v842_v24 = vpop.f32.mrf.mxu1 }
 0x1e8   :  { %v794_v18 = vpop.f32.mrf.mxu3 }
 0x1f0   :  { %v768_v19 = vpop.f32.mrf.mxu2  ;;  %v888_v20 = vpop.f32.mrf.mxu3 }
 0x1f1   :  { %v795_v21 = vadd.f32 %v794_v18, %v768_v19 }
 0x1f3   :  { %v819_v23 = vadd.f32 %v818_v22, %v795_v21 }
 0x1f5   :  { %v843_v25 = vadd.f32 %v842_v24, %v819_v23 }
 0x1f8   :  { %v866_v26 = vpop.f32.mrf.mxu2 }
 0x1f9   :  { %v867_v27 = vadd.f32 %v866_v26, %v843_v25 }
 0x1fb   :  { %v889_v29 = vadd.f32 %v888_v20, %v867_v27 }
 0x1fd   :  { %v898_v30 = vadd.f32 %v897_v28, %v889_v29 }
 0x1ff   :  { %900 = vst.msk [vmem:[#allocation2] sm:$0xf] %vm895_vm3, %v898_v30 }
 0x200   :  { %911 = dma.vmem_to_hbm [thread:$0]  %s907_s27, 64, %s909_s30, [#allocation3]  }
 0x201   :  { %962 = dma.done.wait [#allocation3], 64  }
 0x202   :  { %963 = vsyncadd [#allocation3], 4294967232 }
 0x203   :  { %916 = vsyncpa [#allocation3], 1 }

</bundles_post_ra>
